<compile_context>
chip_gen: v6e
topology: v6e:2x2x1
jax: 0.10.0
libtpu: 0.0.40
codegen_flags: <defaults>
</compile_context>

<pallas_src>
import functools

import jax
import jax.numpy as jnp
from jax import lax
from jax.experimental import pallas as pl
from jax.experimental.pallas import tpu as pltpu

EPS = 1e-5
KSIZE = 4
STRIDE = 2
PAD = 1

# 1-D sub-pixel taps: output row oy = 2*i + dy receives x[i + dr] * w[ky]
# for every (dr, ky) in _TAPS_1D[dy] (same structure for columns / kx).
_TAPS_1D = (((0, 1), (-1, 3)),   # dy (or dx) == 0
            ((0, 2), (1, 0)))    # dy (or dx) == 1

# The 9 distinct (dr, dc) shifted views of the input; order shared by the
# wrapper-side weight packing and the in-kernel concatenation.
_SHIFTS = tuple((dr, dc) for dr in (-1, 0, 1) for dc in (-1, 0, 1))


def _build_folded_weight(w_t):
    """Fold all 16 transposed-conv taps into one (4*Cout, 9*Cin) matrix.

    Row block p = dy*2 + dx (sub-pixel phase), column block s = shift index
    into _SHIFTS.  Entry [p*Cout+oc, s*Cin+ic] = w_t[ic, oc, ky, kx] when
    shift s is a tap of phase p (with its matching (ky, kx)), else 0.
    """
    cin, cout = w_t.shape[0], w_t.shape[1]
    w_oc = jnp.transpose(w_t, (1, 0, 2, 3))          # (Cout, Cin, ky, kx)
    zeros = jnp.zeros((cout, cin), w_t.dtype)
    row_blocks = []
    for dy in range(2):
        for dx in range(2):
            taps = {}
            for dr, ky in _TAPS_1D[dy]:
                for dc, kx in _TAPS_1D[dx]:
                    taps[(dr, dc)] = (ky, kx)
            col_blocks = []
            for s in _SHIFTS:
                if s in taps:
                    ky, kx = taps[s]
                    col_blocks.append(w_oc[:, :, ky, kx])   # (Cout, Cin)
                else:
                    col_blocks.append(zeros)
            row_blocks.append(jnp.concatenate(col_blocks, axis=1))  # (Cout, 9*Cin)
    return jnp.concatenate(row_blocks, axis=0)                      # (4*Cout, 9*Cin)


def _trans_up_kernel(xf_ref, w_ref, o_ref, *, h, w, q):
    # xf_ref : (Cin, F)            zero-padded flat input (batch dim squeezed)
    # w_ref  : (4*Cout, 9*Cin)     folded per-phase weight matrix
    # o_ref  : (4, Cout, L)        phase-major conv + InstanceNorm + ReLU output
    l = h * w
    cout = w_ref.shape[0] // 4
    f32 = jnp.float32

    # Column-wrap masks (hoisted; only dc != 0 shifts use them).
    col = lax.rem(lax.broadcasted_iota(jnp.int32, (1, l), 1), w)
    not_first_col = col != 0          # dc == -1 : drop contributions at j == 0
    not_last_col = col != (w - 1)     # dc == +1 : drop contributions at j == w-1

    # 9 distinct shifted (Cin, L) views (6 of them masked), built once each,
    # concatenated along the contraction axis -> (9*Cin, L).
    views = []
    for dr, dc in _SHIFTS:
        start = q + dr * w + dc                      # static lane offset
        xs = xf_ref[:, start:start + l]              # (Cin, L) shifted view
        if dc == -1:
            xs = jnp.where(not_first_col, xs, 0)
        elif dc == 1:
            xs = jnp.where(not_last_col, xs, 0)
        views.append(xs)
    xcat = jnp.concatenate(views, axis=0)            # (9*Cin, L)

    # Single MXU contraction for all 4 phases, f32 accumulation.
    y = jnp.dot(w_ref[...], xcat, preferred_element_type=f32)   # (4*Cout, L)
    y3 = y.reshape(4, cout, l)                                   # phase-major

    # InstanceNorm2d(affine=False): per-channel stats over all 4*L output
    # positions, one pass (biased variance, clamped at 0, eps=1e-5), then ReLU.
    # NOTE: when a spatial-tile grid axis is added for big L, stream y3 into
    # o_ref per tile and keep only running sum/sumsq scratch live instead.
    inv_n = 1.0 / (4 * l)
    mean = jnp.sum(y3, axis=(0, 2), keepdims=True) * inv_n
    var = jnp.sum(y3 * y3, axis=(0, 2), keepdims=True) * inv_n - mean * mean
    var = jnp.maximum(var, 0.0)
    inv_std = lax.rsqrt(var + EPS)
    o_ref[...] = jnp.maximum((y3 - mean) * inv_std, 0.0).astype(o_ref.dtype)


def trans_up_forward(x, w_t, b=None, *, compute_dtype=jnp.float32):
    """Trans_Up forward pass.

    x   : (N, Cin, H, W) float32 NCHW
    w_t : (Cin, Cout, 4, 4) ConvTranspose2d weight
    b   : (Cout,) ConvTranspose2d bias -- accepted for API parity but unused:
          InstanceNorm2d(affine=False) cancels a per-channel bias exactly.
    compute_dtype: jnp.bfloat16 recommended on v6e/v7x (native bf16 MXU, half
          the input DMA bytes); accumulation and statistics stay float32.
    Returns (N, Cout, 2H, 2W) float32 NCHW.
    """
    del b
    n, cin, h, w = x.shape
    cout = w_t.shape[1]
    l = h * w
    ho, wo = STRIDE * h, STRIDE * w

    # ---- input prep: free reshape + one small halo pad (no im2col) ----
    q = w + 1                                        # max |tap shift| = w + 1
    f = ((q + l + w + 1 + 127) // 128) * 128         # lane-friendly padded length
    xf = jnp.pad(x.reshape(n, cin, l).astype(compute_dtype),
                 ((0, 0), (0, 0), (q, f - q - l)))

    # ---- folded, lane-dense weight matrix (4*Cout, 9*Cin) ----
    w_big = _build_folded_weight(w_t).astype(compute_dtype)

    kernel = functools.partial(_trans_up_kernel, h=h, w=w, q=q)

    out = pl.pallas_call(
        kernel,
        out_shape=jax.ShapeDtypeStruct((n, 4, cout, l), jnp.float32),
        grid_spec=pltpu.PrefetchScalarGridSpec(
            num_scalar_prefetch=0,
            grid=(n,),
            in_specs=[
                # padded flat input, one batch element per step (batch squeezed)
                pl.BlockSpec((None, cin, f), lambda i: (i, 0, 0)),
                # grid-invariant folded weights: constant index map -> fetched once
                pl.BlockSpec((4 * cout, 9 * cin), lambda i: (0, 0)),
            ],
            out_specs=pl.BlockSpec((None, 4, cout, l), lambda i: (i, 0, 0, 0)),
        ),
        compiler_params=pltpu.CompilerParams(
            dimension_semantics=("parallel",)),
    )(xf, w_big)

    # ---- sub-pixel interleave back to NCHW (cheap rearrange of the output) ----
    out = out.reshape(n, 2, 2, cout, h, w)           # (n, dy, dx, co, i, j)
    out = out.transpose(0, 3, 4, 1, 5, 2)            # (n, co, i, dy, j, dx)
    return out.reshape(n, cout, ho, wo)


def _reference(x, w_t, b):
    """Pure-JAX reference (independent conv path) for validation."""
    w_conv = jnp.flip(w_t, axis=(2, 3)).transpose(1, 0, 2, 3)  # (Cout, Cin, 4, 4)
    p = KSIZE - 1 - PAD
    y = lax.conv_general_dilated(
        x, w_conv, window_strides=(1, 1),
        padding=[(p, p), (p, p)], lhs_dilation=(STRIDE, STRIDE),
        dimension_numbers=("NCHW", "OIHW", "NCHW"))
    y = y + b.reshape(1, -1, 1, 1)          # bias kept here to show it cancels
    mean = jnp.mean(y, axis=(2, 3), keepdims=True)
    var = jnp.mean((y - mean) ** 2, axis=(2, 3), keepdims=True)
    return jnp.maximum((y - mean) * lax.rsqrt(var + EPS), 0.0)


if __name__ == "__main__":
    N, C_IN, C_OUT, H, W = 2, 4, 8, 16, 16

    key = jax.random.PRNGKey(0)
    kx, kw, kb = jax.random.split(key, 3)
    x = jax.random.normal(kx, (N, C_IN, H, W), dtype=jnp.float32)
    # ConvTranspose2d weight shape: (in_planes, out_planes, 4, 4)
    w_t = jax.random.normal(kw, (C_IN, C_OUT, KSIZE, KSIZE), dtype=jnp.float32) * 0.1
    b = jax.random.normal(kb, (C_OUT,), dtype=jnp.float32) * 0.1

    ref = jax.block_until_ready(_reference(x, w_t, b))

    # f32 compute path: bit-parity check against the f32 reference.
    out = jax.block_until_ready(trans_up_forward(x, w_t, b))
    assert out.shape == (N, C_OUT, STRIDE * H, STRIDE * W), out.shape
    err = float(jnp.max(jnp.abs(out - ref)))
    assert jnp.allclose(out, ref, rtol=1e-3, atol=1e-3), err

    # bf16 compute path (recommended default on v6e/v7x): looser tolerance,
    # since inputs/weights are rounded to bf16 before the MXU (f32 accum/stats).
    out_bf = jax.block_until_ready(
        trans_up_forward(x, w_t, b, compute_dtype=jnp.bfloat16))
    err_bf = float(jnp.max(jnp.abs(out_bf - ref)))
    assert jnp.allclose(out_bf, ref, rtol=1e-1, atol=1e-1), err_bf

    print("KERNEL_OK")
</pallas_src>

<mosaic_0001>
module attributes {stable_mosaic.version = 11 : i64} {
  func.func @_trans_up_kernel(%arg0: i32, %arg1: memref<1x4x384xf32, #tpu.memory_space<vmem>>, %arg2: memref<32x36xf32, #tpu.memory_space<vmem>>, %arg3: memref<1x4x8x256xf32, #tpu.memory_space<vmem>>) attributes {dimension_semantics = [#tpu.dimension_semantics<parallel>], iteration_bounds = array<i64: 2>, scalar_prefetch = 0 : i64, scratch_operands = 0 : i64, tpu.core_type = #tpu.core_type<tc>, window_params = [{transform_indices = @transform_0, window_bounds = array<i64: 1, 4, 384>}, {pipeline_mode = #tpu.pipeline_mode<synchronous>, transform_indices = @transform_1, window_bounds = array<i64: 32, 36>}, {transform_indices = @transform_2, window_bounds = array<i64: 1, 4, 8, 256>}]} {
    %0 = tpu.iota {dimensions = array<i32: 1>} : vector<1x256xi32>
    %c16_i32 = arith.constant 16 : i32
    %1 = vector.broadcast %c16_i32 : i32 to vector<1x256xi32>
    %2 = arith.remsi %0, %1 : vector<1x256xi32>
    %c0_i32 = arith.constant 0 : i32
    %3 = vector.broadcast %c0_i32 : i32 to vector<1x256xi32>
    %4 = arith.cmpi ne, %2, %3 : vector<1x256xi32>
    %c15_i32 = arith.constant 15 : i32
    %5 = vector.broadcast %c15_i32 : i32 to vector<1x256xi32>
    %6 = arith.cmpi ne, %2, %5 : vector<1x256xi32>
    %c0 = arith.constant 0 : index
    %c0_0 = arith.constant 0 : index
    %c0_1 = arith.constant 0 : index
    %7 = vector.load %arg1[%c0, %c0_0, %c0_1] : memref<1x4x384xf32, #tpu.memory_space<vmem>>, vector<1x4x256xf32>
    %8 = vector.shape_cast %7 : vector<1x4x256xf32> to vector<4x256xf32>
    %c0_i32_2 = arith.constant 0 : i32
    %9 = arith.sitofp %c0_i32_2 : i32 to f32
    %10 = vector.shape_cast %4 : vector<1x256xi1> to vector<1x256xi1>
    %11 = vector.broadcast %10 : vector<1x256xi1> to vector<4x256xi1>
    %12 = vector.broadcast %9 : f32 to vector<4x256xf32>
    %13 = arith.select %11, %8, %12 : vector<4x256xi1>, vector<4x256xf32>
    %c0_3 = arith.constant 0 : index
    %c0_4 = arith.constant 0 : index
    %c1 = arith.constant 1 : index
    %14 = vector.load %arg1[%c0_3, %c0_4, %c1] : memref<1x4x384xf32, #tpu.memory_space<vmem>>, vector<1x4x256xf32>
    %15 = vector.shape_cast %14 : vector<1x4x256xf32> to vector<4x256xf32>
    %c0_5 = arith.constant 0 : index
    %c0_6 = arith.constant 0 : index
    %c2 = arith.constant 2 : index
    %16 = vector.load %arg1[%c0_5, %c0_6, %c2] : memref<1x4x384xf32, #tpu.memory_space<vmem>>, vector<1x4x256xf32>
    %17 = vector.shape_cast %16 : vector<1x4x256xf32> to vector<4x256xf32>
    %c0_i32_7 = arith.constant 0 : i32
    %18 = arith.sitofp %c0_i32_7 : i32 to f32
    %19 = vector.shape_cast %6 : vector<1x256xi1> to vector<1x256xi1>
    %20 = vector.broadcast %19 : vector<1x256xi1> to vector<4x256xi1>
    %21 = vector.broadcast %18 : f32 to vector<4x256xf32>
    %22 = arith.select %20, %17, %21 : vector<4x256xi1>, vector<4x256xf32>
    %c0_8 = arith.constant 0 : index
    %c0_9 = arith.constant 0 : index
    %c16 = arith.constant 16 : index
    %23 = vector.load %arg1[%c0_8, %c0_9, %c16] : memref<1x4x384xf32, #tpu.memory_space<vmem>>, vector<1x4x256xf32>
    %24 = vector.shape_cast %23 : vector<1x4x256xf32> to vector<4x256xf32>
    %c0_i32_10 = arith.constant 0 : i32
    %25 = arith.sitofp %c0_i32_10 : i32 to f32
    %26 = vector.shape_cast %4 : vector<1x256xi1> to vector<1x256xi1>
    %27 = vector.broadcast %26 : vector<1x256xi1> to vector<4x256xi1>
    %28 = vector.broadcast %25 : f32 to vector<4x256xf32>
    %29 = arith.select %27, %24, %28 : vector<4x256xi1>, vector<4x256xf32>
    %c0_11 = arith.constant 0 : index
    %c0_12 = arith.constant 0 : index
    %c17 = arith.constant 17 : index
    %30 = vector.load %arg1[%c0_11, %c0_12, %c17] : memref<1x4x384xf32, #tpu.memory_space<vmem>>, vector<1x4x256xf32>
    %31 = vector.shape_cast %30 : vector<1x4x256xf32> to vector<4x256xf32>
    %c0_13 = arith.constant 0 : index
    %c0_14 = arith.constant 0 : index
    %c18 = arith.constant 18 : index
    %32 = vector.load %arg1[%c0_13, %c0_14, %c18] : memref<1x4x384xf32, #tpu.memory_space<vmem>>, vector<1x4x256xf32>
    %33 = vector.shape_cast %32 : vector<1x4x256xf32> to vector<4x256xf32>
    %c0_i32_15 = arith.constant 0 : i32
    %34 = arith.sitofp %c0_i32_15 : i32 to f32
    %35 = vector.shape_cast %6 : vector<1x256xi1> to vector<1x256xi1>
    %36 = vector.broadcast %35 : vector<1x256xi1> to vector<4x256xi1>
    %37 = vector.broadcast %34 : f32 to vector<4x256xf32>
    %38 = arith.select %36, %33, %37 : vector<4x256xi1>, vector<4x256xf32>
    %c0_16 = arith.constant 0 : index
    %c0_17 = arith.constant 0 : index
    %c32 = arith.constant 32 : index
    %39 = vector.load %arg1[%c0_16, %c0_17, %c32] : memref<1x4x384xf32, #tpu.memory_space<vmem>>, vector<1x4x256xf32>
    %40 = vector.shape_cast %39 : vector<1x4x256xf32> to vector<4x256xf32>
    %c0_i32_18 = arith.constant 0 : i32
    %41 = arith.sitofp %c0_i32_18 : i32 to f32
    %42 = vector.shape_cast %4 : vector<1x256xi1> to vector<1x256xi1>
    %43 = vector.broadcast %42 : vector<1x256xi1> to vector<4x256xi1>
    %44 = vector.broadcast %41 : f32 to vector<4x256xf32>
    %45 = arith.select %43, %40, %44 : vector<4x256xi1>, vector<4x256xf32>
    %c0_19 = arith.constant 0 : index
    %c0_20 = arith.constant 0 : index
    %c33 = arith.constant 33 : index
    %46 = vector.load %arg1[%c0_19, %c0_20, %c33] : memref<1x4x384xf32, #tpu.memory_space<vmem>>, vector<1x4x256xf32>
    %47 = vector.shape_cast %46 : vector<1x4x256xf32> to vector<4x256xf32>
    %c0_21 = arith.constant 0 : index
    %c0_22 = arith.constant 0 : index
    %c34 = arith.constant 34 : index
    %48 = vector.load %arg1[%c0_21, %c0_22, %c34] : memref<1x4x384xf32, #tpu.memory_space<vmem>>, vector<1x4x256xf32>
    %49 = vector.shape_cast %48 : vector<1x4x256xf32> to vector<4x256xf32>
    %c0_i32_23 = arith.constant 0 : i32
    %50 = arith.sitofp %c0_i32_23 : i32 to f32
    %51 = vector.shape_cast %6 : vector<1x256xi1> to vector<1x256xi1>
    %52 = vector.broadcast %51 : vector<1x256xi1> to vector<4x256xi1>
    %53 = vector.broadcast %50 : f32 to vector<4x256xf32>
    %54 = arith.select %52, %49, %53 : vector<4x256xi1>, vector<4x256xf32>
    %55 = tpu.concatenate %13, %15, %22, %29, %31, %38, %45, %47, %54 in 0 : vector<4x256xf32>, vector<4x256xf32>, vector<4x256xf32>, vector<4x256xf32>, vector<4x256xf32>, vector<4x256xf32>, vector<4x256xf32>, vector<4x256xf32>, vector<4x256xf32> -> vector<36x256xf32>
    %c0_24 = arith.constant 0 : index
    %c0_25 = arith.constant 0 : index
    %56 = vector.load %arg2[%c0_24, %c0_25] : memref<32x36xf32, #tpu.memory_space<vmem>>, vector<32x36xf32>
    %cst = arith.constant dense<0.000000e+00> : vector<32x256xf32>
    %57 = tpu.matmul %56, %55, %cst {dimension_numbers = #tpu.dot_dimension_numbers<[1], [0], [0], [1], [0, 0, 1, 1], [], []>} : vector<32x36xf32>, vector<36x256xf32>, vector<32x256xf32> -> vector<32x256xf32>
    %58 = vector.shape_cast %57 : vector<32x256xf32> to vector<4x8x256xf32>
    %cst_26 = arith.constant dense<0.000000e+00> : vector<8xf32>
    %59 = vector.multi_reduction <add>, %58, %cst_26 [0, 2] : vector<4x8x256xf32> to vector<8xf32>
    %60 = vector.shape_cast %59 : vector<8xf32> to vector<1x8x1xf32>
    %cst_27 = arith.constant 9.765625E-4 : f32
    %61 = vector.broadcast %cst_27 : f32 to vector<1x8x1xf32>
    %62 = arith.mulf %60, %61 : vector<1x8x1xf32>
    %63 = arith.mulf %58, %58 : vector<4x8x256xf32>
    %cst_28 = arith.constant dense<0.000000e+00> : vector<8xf32>
    %64 = vector.multi_reduction <add>, %63, %cst_28 [0, 2] : vector<4x8x256xf32> to vector<8xf32>
    %65 = vector.shape_cast %64 : vector<8xf32> to vector<1x8x1xf32>
    %cst_29 = arith.constant 9.765625E-4 : f32
    %66 = vector.broadcast %cst_29 : f32 to vector<1x8x1xf32>
    %67 = arith.mulf %65, %66 : vector<1x8x1xf32>
    %68 = arith.mulf %62, %62 : vector<1x8x1xf32>
    %69 = arith.subf %67, %68 : vector<1x8x1xf32>
    %cst_30 = arith.constant 0.000000e+00 : f32
    %70 = vector.broadcast %cst_30 : f32 to vector<1x8x1xf32>
    %71 = arith.maximumf %69, %70 : vector<1x8x1xf32>
    %cst_31 = arith.constant 9.99999974E-6 : f32
    %72 = vector.broadcast %cst_31 : f32 to vector<1x8x1xf32>
    %73 = arith.addf %71, %72 : vector<1x8x1xf32>
    %74 = math.rsqrt %73 : vector<1x8x1xf32>
    %75 = vector.broadcast %62 : vector<1x8x1xf32> to vector<4x8x256xf32>
    %76 = arith.subf %58, %75 : vector<4x8x256xf32>
    %77 = vector.broadcast %74 : vector<1x8x1xf32> to vector<4x8x256xf32>
    %78 = arith.mulf %76, %77 : vector<4x8x256xf32>
    %cst_32 = arith.constant 0.000000e+00 : f32
    %79 = vector.broadcast %cst_32 : f32 to vector<4x8x256xf32>
    %80 = arith.maximumf %78, %79 : vector<4x8x256xf32>
    %c0_33 = arith.constant 0 : index
    %c0_34 = arith.constant 0 : index
    %c0_35 = arith.constant 0 : index
    %c0_36 = arith.constant 0 : index
    %81 = vector.load %arg3[%c0_33, %c0_34, %c0_35, %c0_36] : memref<1x4x8x256xf32, #tpu.memory_space<vmem>>, vector<1x4x8x256xf32>
    %82 = vector.shape_cast %81 : vector<1x4x8x256xf32> to vector<4x8x256xf32>
    %83 = vector.shape_cast %80 : vector<4x8x256xf32> to vector<1x4x8x256xf32>
    tpu.vector_store %arg3[%c0_33, %c0_34, %c0_35, %c0_36], %83 {strides = array<i32>} : memref<1x4x8x256xf32, #tpu.memory_space<vmem>>, vector<1x4x8x256xf32>,
    return
  }
  func.func @transform_0(%arg0: i32) -> (i32, i32, i32) {
    %c0_i32 = arith.constant 0 : i32
    %c0_i32_0 = arith.constant 0 : i32
    %c0_i32_1 = arith.constant 0 : i32
    return %arg0, %c0_i32, %c0_i32_0 : i32, i32, i32
  }
  func.func @transform_1(%arg0: i32) -> (i32, i32) {
    %c0_i32 = arith.constant 0 : i32
    %c0_i32_0 = arith.constant 0 : i32
    %c0_i32_1 = arith.constant 0 : i32
    return %c0_i32, %c0_i32_0 : i32, i32
  }
  func.func @transform_2(%arg0: i32) -> (i32, i32, i32, i32) {
    %c0_i32 = arith.constant 0 : i32
    %c0_i32_0 = arith.constant 0 : i32
    %c0_i32_1 = arith.constant 0 : i32
    %c0_i32_2 = arith.constant 0 : i32
    return %arg0, %c0_i32, %c0_i32_0, %c0_i32_1 : i32, i32, i32, i32
  }
}

</mosaic_0001>

<bundles_post_ra>
// kernel: tpu_custom_call.1
= control target key start
LH: loop header
LB: loop body
LE: loop exit
PB: predicated region body
PF: predicated region fallthrough
CT: control target
= control target key end

     0   :  { %7 = vsyncpa [#allocation3], 0  ;;  %s1126_s0 = inlined_call_operand.hbm [shape: f32[2,4,384], index: 0, kind: input, shape index: {}]   ;;  %s1127_s1 = inlined_call_operand.hbm [shape: f32[32,36], index: 1, kind: input, shape index: {}]   ;;  %s1128_s2 = inlined_call_operand.hbm [shape: f32[2,4,8,256], index: 2, kind: output, shape index: {}]  }
   0x1   :  { %9 = vsyncpa [#allocation3 + $0x1], 0 }
   0x2   :  { %10 = vsyncpa [#allocation6], 0 }
   0x3   :  { %11 = vsyncpa [#allocation4], 0 }
   0x4   :  { %13 = vsyncpa [#allocation4 + $0x1], 0  ;;  %s873_s9 = smov 0   ;;  %s875_s10 = smov 0  }
   0x5   :  { %s877_s11 = smov 0   ;;  %s879_s12 = smov 0  }
   0x6 LB: > { %s894_s13 = sadd.s32 4294967295, %s840_s12   ;;  %s610_s14 = sadd.s32 4294967294, %s840_s12   ;;  %s840_s12 = sphi %s879_s12, %s1158_s12   ;;  %s836_s11 = sphi %s877_s11, %s1157_s11   ;;  %s832_s10 = sphi %s875_s10, %s1156_s10   ;;  %s828_s9 = sphi %s873_s9, %s1155_s9  }
   0x7   : > { %p39_p0 = scmp.ne.s32.totalorder %s832_s10, %s828_s9  ;;  %p1129_p1 = scmp.eq.s32.totalorder %s894_s13, 0 }
   0x8   : > { %p90_p3 = scmp.eq.s32.totalorder %s610_s14, 1  ;;  %p611_p5 = scmp.ge.s32.totalorder %s840_s12, 1 }
   0x9   : > { %p903_p4 = por %p1129_p1, %p39_p0  ;;  %p97_p7 = scmp.lt.s32.totalorder %s840_s12, 3 }
   0xa   : > { %p908_p6 = por %p90_p3, %p39_p0  ;;  %s842_s18 = smov [#allocation5]  }
   0xb   : > { %s1133_s15 = scalar_select %p903_p4, 1, 0 }
   0xc   : > { %s1134_s16 = scalar_select %p908_p6, 1, 0 }
   0xd   : > { %p913_p8 = pnand %p611_p5, %p97_p7  ;;  %s109_s19 = sshll.u32 %s842_s18, 4  ;;  %s110_s19 = int_to_ptr.vmem [resolvable:$true] %s109_s19 }
   0xe   : > { %s927_s21 = sadd.s32 1, %s840_s12   ;;  %s26_s22 = sadd.s32 1, %s836_s11 }
   0xf   : > { %s1135_s17 = scalar_select %p913_p8, 1, 0 }
  0x10   : > { %p651_p9 = pneg %p913_p8  ;;  %s23_s23 = ssub.s32 %s840_s12, %s927_s21 }
  0x11   : > { %s729_s24 = scalar_lea.vmem %s110_s19, 512  ;;  %p737_p5 = scmp.lt.s32.totalorder %s110_s19, %s110_s19 }
  0x12   : > { %p922_p11 = pnand %p651_p9, %p1129_p1  ;;  %p730_p13 = scmp.ne.s32.totalorder %s110_s19, %s729_s24 }
  0x13   : > { %p738_p7 = scmp.lt.s32.totalorder %s729_s24, %s729_s24 }
  0x14   : > { %p720_p12 = pneg %p922_p11 }
  0x15   : > { %p739_p10 = por %p738_p7, %p737_p5 }
  0x16   : > { %p732_p0 = pnand %p730_p13, %p720_p12 }
  0x18   : > { %p733_p3 = pneg %p732_p0 }
  0x1a   : > { %p740_p2 = pnand %p739_p10, %p733_p3 }
  0x1c   : > { %743 = shalt.err (!%p740_p2)
}
  0x1d   : > { %s843_s25 = smov 128   ;;  %s844_s26 = smov 8  }
  0x1e   : > { %654 = dma.hbm_to_vmem [thread:$0]  (!%p922_p11), %s1127_s1, 512, %s110_s19, [#allocation6], %s843_s25, %s843_s25, %s844_s26  }
  0x1f   : > { %p24_p9 = scmp.eq.s32.totalorder %s23_s23, 0  ;;  %p33_p12 = scmp.ne.s32.totalorder %s836_s11, %s832_s10 }
  0x20   : > { %p34_p10 = scmp.eq.s32.totalorder %s840_s12, 0  ;;  %p664_p2 = scmp.lt.s32.totalorder %s840_s12, 2 }
  0x21   : > { %s944_s29 = scalar_select %p24_p9, %s836_s11, %s26_s22  }
  0x22   : > { %p35_p13 = por %p34_p10, %p33_p12  ;;  %p1137_p0 = scmp.eq.s32.totalorder %s894_s13, 1 }
  0x23   : > { %s123_s3 = sand.u32 1, %s836_s11   ;;  %s641_s4 = smul.u32 192, %s840_s12 }
  0x24   : > { %p948_p3 = por %p1137_p0, %p33_p12  ;;  %s640_s5 = smul.u32 12, %s123_s3 }
  0x25   : > { %p954_p5 = pnand %p664_p2, %p35_p13  ;;  %s961_s14 = scalar_lea.hbm %s1126_s0, %s641_s4 }
  0x26   : > { %s1138_s30 = scalar_select %p948_p3, 1, 0 }
  0x27   : > { %s127_s18 = scalar_lea.vmem [#allocation2], %s640_s5  ;;  %s124_s20 = scalar_lea.sflag [#allocation3], %s123_s3 }
  0x28   : > { %s135_s19 = sshll.u32 %s127_s18, 4  ;;  %s744_s22 = scalar_lea.hbm %s961_s14, 192  ;;  %s136_s19 = int_to_ptr.vmem [resolvable:$true] %s135_s19 }
  0x29   : > { %p745_p11 = scmp.ne.s32.totalorder %s961_s14, %s744_s22  ;;  %p746_p7 = pneg %p954_p5 }
  0x2a   : > { %s749_s25 = scalar_lea.hbm %s1126_s0, 384  ;;  %p750_p10 = scmp.lt.s32.totalorder %s961_s14, %s1126_s0 }
  0x2b   : > { %p747_p9 = pnand %p746_p7, %p745_p11  ;;  %p751_p2 = scmp.lt.s32.totalorder %s749_s25, %s744_s22 }
  0x2d   : > { %p748_p12 = pneg %p747_p9  ;;  %p752_p13 = por %p751_p2, %p750_p10 }
  0x2f   : > { %p753_p0 = pnand %p752_p13, %p748_p12 }
  0x31   : > { %756 = shalt.err (!%p753_p0)
}
  0x32   : > { %s757_s28 = scalar_lea.vmem %s136_s19, 192  ;;  %s845_s3 = smov [#allocation2]  }
  0x33   : > { %p758_p1 = scmp.ne.s32.totalorder %s136_s19, %s757_s28  ;;  %s762_s4 = sshll.u32 %s845_s3, 4  ;;  %s763_s4 = int_to_ptr.vmem [resolvable:$false] %s762_s4 }
  0x34   : > { %s764_s5 = scalar_lea.vmem %s763_s4, 384  ;;  %p765_p11 = scmp.lt.s32.totalorder %s136_s19, %s763_s4 }
  0x35   : > { %p760_p6 = pnand %p758_p1, %p746_p7  ;;  %p766_p9 = scmp.lt.s32.totalorder %s764_s5, %s757_s28 }
  0x37   : > { %p761_p3 = pneg %p760_p6  ;;  %p767_p4 = por %p766_p9, %p765_p11 }
  0x39   : > { %p768_p8 = pnand %p767_p4, %p761_p3 }
  0x3b   : > { %771 = shalt.err (!%p768_p8)
}
  0x3c   : > { %658 = dma.hbm_to_vmem [thread:$0]  (!%p954_p5), %s961_s14, 192, %s136_s19, %s124_s20  }
  0x3d   : > { %p1140_p12 = scmp.ne.s32.totalorder %s1135_s17, 0 }
  0x3e   : > { %s980_s7 = sand.u32 (!%p1140_p12), 1, %s832_s10   ;;  %p1141_p1 = scmp.ne.s32.totalorder (!%p1140_p12), %s1133_s15, 0 }
  0x3f   : > { %144 = sbr.rel (%p1140_p12) target bundleno = 628 (0x274), region = 28  ;;  %s147_s18 = scalar_lea.sflag (!%p1140_p12), [#allocation3], %s980_s7 }
  0x40   : > { %s642_s8 = smul.u32 (!%p1140_p12), 12, %s980_s7 }
  0x42   : > { %s150_s22 = scalar_lea.vmem (!%p1140_p12), [#allocation2], %s642_s8 }
  0x44   : > { %815 = dma.done.wait (%p1141_p1), %s147_s18, 192  }
  0x45   : > { %817 = vsyncadd (%p1141_p1), %s147_s18, 4294967104  ;;  %p1142_p4 = scmp.eq.s32.totalorder %s894_s13, 0 }
  0x47   : > { %819 = dma.done.wait (%p1142_p4), [#allocation6], 512   ;;  %p1143_p6 = pmov %p1142_p4 }
  0x48   : > { %v207_v0 = vld [vmem:[%s150_s22 + $0x8] sm:$0xf]  ;;  %v992_v1 = vld [vmem:[%s150_s22] sm:$0xff]  ;;  %s846_s17 = smov 110   ;;  %s847_s6 = smov 94   ;;  %v853_v5 = vmov 0.0   ;;  %v175_v6 = vlaneseq }
  0x49   : > { %821 = vsyncadd (%p1143_p6), [#allocation6], 4294966784  ;;  %245 = vrot.lane.b32.xlu1 %v207_v0, %s846_s17  ;;  %271 = vrot.lane.b32.xlu0 %v207_v0, %s847_s6  ;;  %v996_v2 = vcombine.high %v992_v1, %v992_v1  ;;  %s848_s14 = smov 96   ;;  %s849_s15 = smov 95   ;;  %v281_v3 = vcombine.low %v207_v0, %v207_v0  ;;  %v280_v4 = vcombine.low %v992_v1, %v992_v1  ;;  %vm273_vm0 = vcmask 769024  }
  0x4a   : > { %s850_s19 = smov 112   ;;  %s851_s20 = smov 111   ;;  %423 = vmatprep.mubr.f32.mxu0 %v853_v5  ;;  %435 = vmatprep.mubr.f32.mxu1 %v853_v5  ;;  %v176_v7 = vand.u32 127, %v175_v6  ;;  %vm327_vm2 = vcmask 1043456   ;;  %vm260_vm4 = vcmask 785408   ;;  %vm322_vm6 = vcmask 777216  }
  0x4b   : > { %s852_s23 = smov 126   ;;  %s854_s24 = smov 127   ;;  %vm247_vm8 = vcmask 900096   ;;  %vm234_vm9 = vcmask 916480   ;;  %vm305_vm10 = vcmask 908288   ;;  %vm221_vm11 = vcmask 1031168  }
  0x4c   : > { %v177_v8 = vadd.s32 128, %v176_v7  ;;  %v182_v17 = vand.u32 15, %v176_v7  ;;  %vm288_vm12 = vcmask 1039360   ;;  %vm340_vm13 = vcmask 293888   ;;  %s617_s25 = sshll.u32 %s980_s7, 6  ;;  %s629_s26 = sshll.u32 %s894_s13, 10 }
  0x4d   : > { %258 = vrot.lane.b32.xlu1 %v207_v0, %s848_s14  ;;  %269 = vrot.lane.b32.xlu0 %v996_v2, %s847_s6  ;;  %s174_s27 = scalar_lea.vmem [#allocation7], %s617_s25  ;;  %s1081_s5 = scalar_lea.hbm %s1128_s2, %s629_s26 }
  0x4e   : > { %v189_v9 = vand.u32 15, %v177_v8  ;;  %vm1024_vm3 = vcmp.ne.s32.totalorder %v182_v17, 15  ;;  %vm1038_vm7 = vcmp.ne.s32.totalorder %v182_v17, 0  ;;  %s527_s28 = sshll.u32 %s174_s27, 4  ;;  %s514_s13 = scalar_lea.sflag [#allocation4], %s980_s7  ;;  %s1083_s28 = int_to_ptr.vmem [resolvable:$true] %s527_s28 }
  0x4f   : > { %s772_s8 = scalar_lea.vmem %s1083_s28, 1024  ;;  %p1152_p3 = scmp.ne.s32.totalorder %s1138_s30, 0 }
  0x50   : > { %vm1016_vm1 = vcmp.ne.s32.totalorder %v189_v9, 15  ;;  %vm1032_vm5 = vcmp.ne.s32.totalorder %v189_v9, 0  ;;  %p773_p8 = scmp.ne.s32.totalorder %s1083_s28, %s772_s8  ;;  %s855_s18 = smov [#allocation7]  }
  0x51   : > { %243 = vrot.lane.b32.xlu1 %v996_v2, %s846_s17  ;;  %256 = vrot.lane.b32.xlu0 %v996_v2, %s848_s14  ;;  %s776_s22 = sshll.u32 %s855_s18, 4  ;;  %s777_s22 = int_to_ptr.vmem [resolvable:$false] %s776_s22 }
  0x52   : > { %p774_p5 = pnand %p773_p8, %p1152_p3  ;;  %p779_p10 = scmp.lt.s32.totalorder %s1083_s28, %s777_s22 }
  0x54   : > { %p775_p7 = pneg %p774_p5 }
  0x55   : > { %241 = vrot.lane.b32.xlu1 %v992_v1, %s846_s17  ;;  %267 = vrot.lane.b32.xlu0 %v992_v1, %s847_s6  ;;  %s778_s17 = scalar_lea.vmem %s777_s22, 2048 }
  0x56   : > { %p780_p2 = scmp.lt.s32.totalorder %s778_s17, %s772_s8 }
  0x58   : > { %p781_p13 = por %p780_p2, %p779_p10 }
  0x59   : > { %318 = vrot.lane.b32.xlu1 %v992_v1, %s849_s15  ;;  %254 = vrot.lane.b32.xlu0 %v992_v1, %s848_s14 }
  0x5a   : > { %p782_p0 = pnand %p781_p13, %p775_p7 }
  0x5d   : > { %230 = vrot.lane.b32.xlu1 %v996_v2, %s850_s19  ;;  %320 = vrot.lane.b32.xlu0 %v281_v3, %s849_s15 }
  0x61   : > { %316 = vrot.lane.b32.xlu1 %v280_v4, %s849_s15  ;;  %232 = vrot.lane.b32.xlu0 %v207_v0, %s850_s19 }
  0x65   : > { %301 = vrot.lane.b32.xlu1 %v996_v2, %s851_s20  ;;  %228 = vrot.lane.b32.xlu0 %v992_v1, %s850_s19 }
  0x69   : > { %217 = vrot.lane.b32.xlu1 %v996_v2, %s852_s23  ;;  %303 = vrot.lane.b32.xlu0 %v207_v0, %s851_s20 }
  0x6d   : > { %299 = vrot.lane.b32.xlu1 %v992_v1, %s851_s20  ;;  %219 = vrot.lane.b32.xlu0 %v207_v0, %s852_s23 }
  0x71   : > { %284 = vrot.lane.b32.xlu1 %v992_v1, %s854_s24  ;;  %215 = vrot.lane.b32.xlu0 %v992_v1, %s852_s23 }
  0x75   : > { %282 = vrot.lane.b32.xlu1 %v280_v4, %s854_s24  ;;  %286 = vrot.lane.b32.xlu0 %v281_v3, %s854_s24 }
  0xbb   : > { %v246_v10 = vpop.permute.xlu1 %245  ;;  %v272_v11 = vpop.permute.xlu0 %271 }
  0xbf   : > { %v259_v13 = vpop.permute.xlu1 %258  ;;  %v270_v14 = vpop.permute.xlu0 %269 }
  0xc0   : > { %v275_v15 = vsel %vm273_vm0, %v270_v14, %v272_v11  ;;  %v204_v11 = vsel %vm1038_vm7, %v992_v1, 0.0  ;;  %v337_v1 = vld [vmem:[#allocation5 + $0x8] sm:$0xff] }
  0xc1   : > { %v279_v16 = vsel %vm1016_vm1, %v275_v15, 0.0 }
  0xc2   : > { %618 = vmatprep.subr.msk.mxu0 %vm327_vm2, %v279_v16  ;;  %630 = vmatprep.subr.msk.mxu1 %vm327_vm2, %v279_v16 }
  0xc3   : > { %v244_v18 = vpop.permute.xlu1 %243  ;;  %v257_v19 = vpop.permute.xlu0 %256 }
  0xc4   : > { %v262_v28 = vsel %vm260_vm4, %v257_v19, %v259_v13  ;;  %v249_v40 = vsel %vm247_vm8, %v244_v18, %v246_v10  ;;  %v205_v10 = vsel %vm1032_vm5, %v996_v2, 0.0  ;;  %v339_v2 = vld [vmem:[#allocation5 + $0x18] sm:$0xff] }
  0xc5   : > { %v266_v31 = vsel %vm1032_vm5, %v262_v28, 0.0  ;;  %v253_v44 = vsel %vm1016_vm1, %v249_v40, 0.0 }
  0xc6   : > { %v313_v47 = vrot.slane %v253_v44, 4 }
  0xc7   : > { %v242_v21 = vpop.permute.xlu1 %241  ;;  %v268_v22 = vpop.permute.xlu0 %267 }
  0xc8   : > { %v274_v23 = vsel %vm273_vm0, %v268_v22, %v270_v14  ;;  %v248_v45 = vsel %vm247_vm8, %v242_v21, %v244_v18  ;;  %v336_v18 = vld [vmem:[#allocation5] sm:$0xff] }
  0xc9   : > { %v278_v24 = vsel %vm1024_vm3, %v274_v23, 0.0  ;;  %v252_v50 = vsel %vm1024_vm3, %v248_v45, 0.0 }
  0xca   : > { %619 = vmatpush1.msk.msra.mxu0 %vm327_vm2, %v278_v24  ;;  %635 = vmatpush1.msk.msra.mxu1 %vm327_vm2, %v278_v24  ;;  %v312_v55 = vrot.slane %v252_v50, 4 }
  0xcb   : > { %v319_v25 = vpop.permute.xlu1 %318  ;;  %v255_v26 = vpop.permute.xlu0 %254 }
  0xcc   : > { %v261_v34 = vsel %vm260_vm4, %v255_v26, %v257_v19  ;;  %v338_v19 = vld [vmem:[#allocation5 + $0x10] sm:$0xff] }
  0xcd   : > { %v265_v38 = vsel %vm1038_vm7, %v261_v34, 0.0 }
  0xcf   : > { %v231_v29 = vpop.permute.xlu1 %230  ;;  %v321_v30 = vpop.permute.xlu0 %320 }
  0xd0   : > { %v324_v32 = vsel %vm322_vm6, %v319_v25, %v321_v30 }
  0xd1   : > { %v335_v35 = vsel %vm327_vm2, %v266_v31, %v324_v32 }
  0xd2   : > { %383 = vmatprep.subr.mxu0 %v335_v35  ;;  %631 = vmatprep.subr.mxu1 %v335_v35 }
  0xd3   : > { %v317_v36 = vpop.permute.xlu1 %316  ;;  %v233_v37 = vpop.permute.xlu0 %232 }
  0xd4   : > { %v323_v39 = vsel %vm322_vm6, %v317_v36, %v319_v25  ;;  %v236_v46 = vsel %vm234_vm9, %v231_v29, %v233_v37 }
  0xd5   : > { %v334_v41 = vsel %vm327_vm2, %v265_v38, %v323_v39  ;;  %v240_v52 = vsel %vm1032_vm5, %v236_v46, 0.0 }
  0xd6   : > { %384 = vmatpush1.msra.mxu0 %v334_v41  ;;  %636 = vmatpush1.msra.mxu1 %v334_v41  ;;  %v296_v58 = vrot.slane %v240_v52, 4 }
  0xd7   : > { %v302_v42 = vpop.permute.xlu1 %301  ;;  %v229_v43 = vpop.permute.xlu0 %228 }
  0xd8   : > { %v235_v54 = vsel %vm234_vm9, %v229_v43, %v231_v29 }
  0xd9   : > { %v239_v61 = vsel %vm1038_vm7, %v235_v54, 0.0 }
  0xda   : > { %v295_v6 = vrot.slane %v239_v61, 4 }
  0xdb   : > { %v218_v48 = vpop.permute.xlu1 %217  ;;  %v304_v49 = vpop.permute.xlu0 %303 }
  0xdc   : > { %v307_v51 = vsel %vm305_vm10, %v302_v42, %v304_v49 }
  0xdd   : > { %v333_v53 = vsel %vm327_vm2, %v307_v51, %v313_v47 }
  0xde   : > { %385 = vmatprep.subr.mxu0 %v333_v53  ;;  %632 = vmatprep.subr.mxu1 %v333_v53 }
  0xdf   : > { %v300_v56 = vpop.permute.xlu1 %299  ;;  %v220_v57 = vpop.permute.xlu0 %219 }
  0xe0   : > { %v306_v59 = vsel %vm305_vm10, %v300_v56, %v302_v42  ;;  %v223_v60 = vsel %vm221_vm11, %v218_v48, %v220_v57 }
  0xe1   : > { %v227_v62 = vsel %vm1016_vm1, %v223_v60, 0.0  ;;  %v332_v63 = vsel %vm327_vm2, %v306_v59, %v312_v55 }
  0xe2   : > { %386 = vmatpush1.msra.mxu0 %v332_v63  ;;  %637 = vmatpush1.msra.mxu1 %v332_v63  ;;  %v331_v0 = vsel %vm327_vm2, %v227_v62, %v296_v58 }
  0xe3   : > { %v285_v3 = vpop.permute.xlu1 %284  ;;  %387 = vmatprep.subr.mxu0 %v331_v0  ;;  %633 = vmatprep.subr.mxu1 %v331_v0  ;;  %v216_v4 = vpop.permute.xlu0 %215 }
  0xe4   : > { %v222_v7 = vsel %vm221_vm11, %v216_v4, %v218_v48 }
  0xe5   : > { %v226_v8 = vsel %vm1024_vm3, %v222_v7, 0.0 }
  0xe6   : > { %v330_v9 = vsel %vm327_vm2, %v226_v8, %v295_v6 }
  0xe7   : > { %v283_v12 = vpop.permute.xlu1 %282  ;;  %388 = vmatpush1.msra.mxu0 %v330_v9  ;;  %638 = vmatpush1.msra.mxu1 %v330_v9  ;;  %v287_v13 = vpop.permute.xlu0 %286 }
  0xe8   : > { %v289_v14 = vsel %vm288_vm12, %v283_v12, %v285_v3  ;;  %v290_v15 = vsel %vm288_vm12, %v285_v3, %v287_v13 }
  0xe9   : > { %v329_v16 = vsel %vm327_vm2, %v205_v10, %v290_v15  ;;  %v328_v17 = vsel %vm327_vm2, %v204_v11, %v289_v14 }
  0xea   : > { %389 = vmatprep.subr.mxu0 %v329_v16  ;;  %634 = vmatprep.subr.mxu1 %v329_v16 }
  0xeb   : > { %390 = vmatpush1.msra.mxu0 %v328_v17  ;;  %639 = vmatpush1.msra.mxu1 %v328_v17 }
  0xec   : > { %620 = vmatmul.mubr.msk.f32.vlgmr.msra.gmra.mxu0 %vm340_vm13, %v336_v18  ;;  %622 = vmatmul.mubr.msk.f32.vlgmr.msra.gmra.mxu1 %vm340_vm13, %v338_v19 }
  0xed   : > { %429 = vmatprep.mubr.f32.mxu0 %v853_v5  ;;  %441 = vmatprep.mubr.f32.mxu1 %v853_v5 }
  0xf0   : > { %621 = vmatmul.mubr.msk.f32.gmra.mxu0 %vm340_vm13, %v337_v1  ;;  %623 = vmatmul.mubr.msk.f32.gmra.mxu1 %vm340_vm13, %v339_v2 }
 0x1ac   : > { %v425_v20 = vpop.f32.mrf.mxu0  ;;  %v437_v21 = vpop.f32.mrf.mxu1 }
 0x1ad   : > { %v458_v23 = vmul.f32 %v425_v20, %v425_v20  ;;  %v462_v35 = vmul.f32 %v437_v21, %v437_v21 }
 0x1ae   : > { %v427_v22 = vpop.f32.mrf.mxu0  ;;  %v439_v27 = vpop.f32.mrf.mxu1 }
 0x1af   : > { %v448_v24 = vadd.f32 %v427_v22, %v425_v20  ;;  %v459_v25 = vmul.f32 %v427_v22, %v427_v22  ;;  %v463_v40 = vmul.f32 %v439_v27, %v439_v27 }
 0x1b0   : > { %v431_v26 = vpop.f32.mrf.mxu0  ;;  %v443_v5 = vpop.f32.mrf.mxu1 }
 0x1b1   : > { %v466_v28 = vadd.f32 %v459_v25, %v458_v23  ;;  %v449_v29 = vadd.f32 %v448_v24, %v431_v26  ;;  %v460_v30 = vmul.f32 %v431_v26, %v431_v26  ;;  %v464_v41 = vmul.f32 %v443_v5, %v443_v5 }
 0x1b2   : > { %v433_v31 = vpop.f32.mrf.mxu0  ;;  %v445_v42 = vpop.f32.mrf.mxu1 }
 0x1b3   : > { %v467_v32 = vadd.f32 %v466_v28, %v460_v30  ;;  %v450_v33 = vadd.f32 %v449_v29, %v433_v31  ;;  %v461_v34 = vmul.f32 %v433_v31, %v433_v31  ;;  %v465_v45 = vmul.f32 %v445_v42, %v445_v42 }
 0x1b5   : > { %v468_v36 = vadd.f32 %v467_v32, %v461_v34  ;;  %v451_v37 = vadd.f32 %v450_v33, %v437_v21 }
 0x1b7   : > { %v469_v38 = vadd.f32 %v468_v36, %v462_v35  ;;  %v452_v39 = vadd.f32 %v451_v37, %v439_v27 }
 0x1b9   : > { %v453_v43 = vadd.f32 %v452_v39, %v443_v5  ;;  %v470_v44 = vadd.f32 %v469_v38, %v463_v40 }
 0x1bb   : > { %v454_v46 = vadd.f32 %v453_v43, %v445_v42  ;;  %v471_v47 = vadd.f32 %v470_v44, %v464_v41 }
 0x1bd   : > { %455 = vadd.xlane.f32.xlu0 %v454_v46  ;;  %v472_v48 = vadd.f32 %v471_v47, %v465_v45 }
 0x1bf   : > { %473 = vadd.xlane.f32.xlu1 %v472_v48 }
 0x246   : > { %v456_v49 = vpop.xlane.xlu0 %455 }
 0x247   : > { %v457_v50 = vmul.f32 0.0009765625, %v456_v49 }
 0x248   : > { %v474_v51 = vpop.xlane.xlu1 %473 }
 0x249   : > { %v475_v52 = vmul.f32 0.0009765625, %v474_v51  ;;  %v476_v53 = vmul.f32 %v457_v50, %v457_v50  ;;  %v481_v57 = vsub.f32 %v425_v20, %v457_v50  ;;  %v482_v58 = vsub.f32 %v427_v22, %v457_v50 }
 0x24a   : > { %v483_v59 = vsub.f32 %v431_v26, %v457_v50  ;;  %v484_v60 = vsub.f32 %v433_v31, %v457_v50  ;;  %v485_v62 = vsub.f32 %v437_v21, %v457_v50  ;;  %v486_v63 = vsub.f32 %v439_v27, %v457_v50 }
 0x24b   : > { %v477_v54 = vsub.f32 %v475_v52, %v476_v53  ;;  %v487_v0 = vsub.f32 %v443_v5, %v457_v50  ;;  %v488_v3 = vsub.f32 %v445_v42, %v457_v50 }
 0x24d   : > { %v478_v55 = vmax.f32 %v477_v54, 0.0 }
 0x24f   : > { %v479_v56 = vadd.f32 1e-05, %v478_v55 }
 0x251   : > { %716 = vrsqrt.f32 %v479_v56 }
 0x25e   : > { %v717_v61 = vpop.eup %716 }
 0x25f   : > { %v489_v4 = vmul.f32 %v717_v61, %v481_v57  ;;  %v490_v6 = vmul.f32 %v717_v61, %v482_v58  ;;  %v491_v7 = vmul.f32 %v717_v61, %v483_v59  ;;  %v492_v8 = vmul.f32 %v717_v61, %v484_v60 }
 0x260   : > { %v493_v9 = vmul.f32 %v717_v61, %v485_v62  ;;  %v494_v10 = vmul.f32 %v717_v61, %v486_v63  ;;  %v495_v11 = vmul.f32 %v717_v61, %v487_v0  ;;  %v496_v12 = vmul.f32 %v717_v61, %v488_v3 }
 0x261   : > { %v497_v13 = vmax.f32 %v489_v4, 0.0  ;;  %v498_v14 = vmax.f32 %v490_v6, 0.0  ;;  %v499_v15 = vmax.f32 %v491_v7, 0.0  ;;  %v500_v16 = vmax.f32 %v492_v8, 0.0 }
 0x262   : > { %v501_v17 = vmax.f32 %v493_v9, 0.0  ;;  %v502_v18 = vmax.f32 %v494_v10, 0.0  ;;  %v503_v19 = vmax.f32 %v495_v11, 0.0  ;;  %v504_v1 = vmax.f32 %v496_v12, 0.0 }
 0x263   : > { %505 = vst [vmem:[%s174_s27] sm:$0xff] %v497_v13  ;;  %506 = vst [vmem:[%s174_s27 + $0x8] sm:$0xff] %v498_v14 }
 0x264   : > { %507 = vst [vmem:[%s174_s27 + $0x10] sm:$0xff] %v499_v15  ;;  %508 = vst [vmem:[%s174_s27 + $0x18] sm:$0xff] %v500_v16 }
 0x265   : > { %509 = vst [vmem:[%s174_s27 + $0x20] sm:$0xff] %v501_v17  ;;  %510 = vst [vmem:[%s174_s27 + $0x28] sm:$0xff] %v502_v18 }
 0x266   : > { %511 = vst [vmem:[%s174_s27 + $0x30] sm:$0xff] %v503_v19  ;;  %512 = vst [vmem:[%s174_s27 + $0x38] sm:$0xff] %v504_v1 }
 0x267   : > { %785 = shalt.err (!%p782_p0)
}
 0x268   : > { %s786_s6 = scalar_lea.hbm %s1081_s5, 1024  ;;  %s790_s19 = scalar_lea.hbm %s1128_s2, 2048 }
 0x269   : > { %p787_p11 = scmp.ne.s32.totalorder %s1081_s5, %s786_s6  ;;  %p791_p1 = scmp.lt.s32.totalorder %s1081_s5, %s1128_s2 }
 0x26a   : > { %p792_p4 = scmp.lt.s32.totalorder %s790_s19, %s786_s6 }
 0x26b   : > { %p788_p9 = pnand %p787_p11, %p1152_p3 }
 0x26c   : > { %p793_p6 = por %p792_p4, %p791_p1 }
 0x26d   : > { %p789_p12 = pneg %p788_p9 }
 0x26f   : > { %p794_p8 = pnand %p793_p6, %p789_p12 }
 0x271   : > { %797 = shalt.err (!%p794_p8)
}
 0x272   : > { %s856_s24 = smov 256   ;;  %s857_s25 = smov 16  }
 0x273   : > { %649 = dma.vmem_to_hbm [thread:$0]  (%p1152_p3), %s1083_s28, 1024, %s1081_s5, %s514_s13, %s856_s24, %s856_s24, %s857_s25  }
 0x274 PF: > { %s542_s26 = sand.u32 1, %s828_s9   ;;  %p1153_p5 = scmp.ne.s32.totalorder %s1134_s16, 0 }
 0x275   : > { %p1154_p7 = scmp.ge.s32.totalorder %s840_s12, 2  ;;  %s543_s27 = scalar_lea.sflag [#allocation4], %s542_s26 }
 0x277   : > { %p660_p10 = pnand %p1154_p7, %p1153_p5 }
 0x279   : > { %p661_p2 = pneg %p660_p10 }
 0x27b   : > { %823 = dma.done.wait (%p661_p2), %s543_s27, 1024  }
 0x27c   : > { %825 = vsyncadd (%p661_p2), %s543_s27, 4294966272  ;;  %p16_p13 = scmp.ge.s32.totalorder %s927_s21, 4   ;;  %s1155_s9 = smov %s832_s10 }
 0x27d   : > { %s1156_s10 = smov %s836_s11  ;;  %s1157_s11 = smov %s944_s29 }
 0x27e   : > { %s1158_s12 = smov %s927_s21  ;;  %18 = sbr.rel (!%p16_p13) target bundleno = 6 (0x6), region = 77 }
 0x283   :  { %548 = vsyncpa [#allocation3], 1 }
 0x284   :  { %550 = vsyncpa [#allocation3 + $0x1], 1 }
 0x285   :  { %551 = vsyncpa [#allocation6], 1 }
 0x286   :  { %552 = vsyncpa [#allocation4], 1 }
 0x287   :  { %554 = vsyncpa [#allocation4 + $0x1], 1 }

</bundles_post_ra>
